<compile_context>
chip_gen: v7x
topology: tpu7x:2x2x1
jax: 0.10.0
libtpu: 0.0.40
codegen_flags: <defaults>
</compile_context>

<pallas_src>
import functools
import math

import jax
import jax.numpy as jnp
from jax.experimental import pallas as pl
from jax.experimental.pallas import tpu as pltpu


# ----------------------------- kernel -------------------------------------- #

def _embedding_gather_kernel(ids_ref, w_hbm, o_ref, rows_vmem, sems, *,
                             scale, group):
    # ids_ref  : (n_pad,) int32 in SMEM (scalar-prefetched token ids).
    # w_hbm    : (vocab, D) weight table, left in HBM (pl.ANY).
    # o_ref    : (group, D) output tile in VMEM.
    # rows_vmem: (group, D) VMEM scratch the gathered rows land in.
    # sems     : (group,) DMA semaphores, one per in-flight row copy.
    base = pl.program_id(0) * group

    # Issue all `group` row-gather DMAs up front (concurrent small random
    # reads: concurrency, not bandwidth, is what hides their latency).
    for g in range(group):                              # static, unrolled
        row = ids_ref[base + g]
        pltpu.make_async_copy(
            w_hbm.at[pl.ds(row, 1), :],
            rows_vmem.at[pl.ds(g, 1), :],
            sems.at[g],
        ).start()

    # Wait for all of them.
    for g in range(group):
        pltpu.make_async_copy(
            w_hbm.at[pl.ds(0, 1), :],                   # same-shape descriptor
            rows_vmem.at[pl.ds(g, 1), :],
            sems.at[g],
        ).wait()

    # One dense (group, D) scale + store: unmasked, sublane/lane-dense vst.
    o_ref[...] = (rows_vmem[...].astype(jnp.float32) * scale).astype(o_ref.dtype)


# ----------------------------- wrapper -------------------------------------- #

def _pick_group(n, target):
    """Largest multiple of 8 <= target that divides n, falling back to 8."""
    g = min(target, max(8, (n // 8) * 8))
    g -= g % 8
    while g > 8 and n % g != 0:
        g -= 8
    return max(g, 8)


def embedding_forward(ids, weight, *, group=64):
    """ids: (B, S) int token ids; weight: (vocab, d_model) float table.

    Returns (B, S, d_model) = weight[ids] * sqrt(d_model), matching the torch
    `Embedding` module's forward.
    """
    B, S = ids.shape
    V, D = weight.shape
    N = B * S
    scale = float(math.sqrt(D))

    group = _pick_group(N, group)
    n_blocks = pl.cdiv(N, group)
    n_pad = n_blocks * group

    ids_flat = ids.reshape(N).astype(jnp.int32)
    if n_pad != N:                                       # ragged-tail fallback only
        ids_flat = jnp.concatenate(
            [ids_flat, jnp.zeros((n_pad - N,), jnp.int32)])

    grid_spec = pltpu.PrefetchScalarGridSpec(
        num_scalar_prefetch=1,                           # ids land in SMEM
        grid=(n_blocks,),
        in_specs=[pl.BlockSpec(memory_space=pl.ANY)],    # weight stays in HBM
        out_specs=pl.BlockSpec((group, D), lambda i, ids_ref: (i, 0)),
        scratch_shapes=[
            pltpu.VMEM((group, D), weight.dtype),        # gathered-row tile
            pltpu.SemaphoreType.DMA((group,)),           # one sem per row DMA
        ],
    )

    itemsize = jnp.dtype(weight.dtype).itemsize
    cost = pl.CostEstimate(
        flops=int(N) * int(D),                           # the scale multiply
        transcendentals=0,
        bytes_accessed=int(2 * N * D * itemsize + N * 4),
    )

    out = pl.pallas_call(
        functools.partial(_embedding_gather_kernel, scale=scale, group=group),
        out_shape=jax.ShapeDtypeStruct((n_pad, D), weight.dtype),
        grid_spec=grid_spec,
        compiler_params=pltpu.CompilerParams(
            dimension_semantics=("parallel",)),          # steps are independent
        cost_estimate=cost,
    )(ids_flat, weight)

    if n_pad != N:
        out = out[:N]
    return out.reshape(B, S, D)


# ------------------------------- main --------------------------------------- #

if __name__ == "__main__":
    B, S = 2, 8            # batch=2, seq=8
    D_MODEL = 32           # hidden=32
    VOCAB = 64

    key = jax.random.PRNGKey(0)
    k_ids, k_w = jax.random.split(key)
    ids = jax.random.randint(k_ids, (B, S), 0, VOCAB, dtype=jnp.int32)
    weight = jax.random.normal(k_w, (VOCAB, D_MODEL), dtype=jnp.float32)

    out = embedding_forward(ids, weight)
    out = jax.block_until_ready(out)

    ref = weight[ids] * math.sqrt(D_MODEL)               # pure-JAX reference
    assert out.shape == (B, S, D_MODEL)
    assert jnp.allclose(out, ref, atol=1e-6, rtol=1e-6), "embedding mismatch"

    print("KERNEL_OK")
</pallas_src>

<mosaic_0001>
module attributes {stable_mosaic.version = 11 : i64} {
  func.func @_embedding_gather_kernel(%arg0: i32, %arg1: memref<16xi32, #tpu.memory_space<smem>>, %arg2: memref<64x32xf32, #tpu.memory_space<any>>, %arg3: memref<16x32xf32, #tpu.memory_space<vmem>>, %arg4: memref<16x32xf32, #tpu.memory_space<vmem>>, %arg5: memref<16x!tpu.dma_semaphore, #tpu.memory_space<semaphore_mem>>) attributes {dimension_semantics = [#tpu.dimension_semantics<parallel>], iteration_bounds = array<i64: 1>, scalar_prefetch = 1 : i64, scratch_operands = 2 : i64, tpu.core_type = #tpu.core_type<tc>, window_params = [{}, {transform_indices = @transform_1, window_bounds = array<i64: 16, 32>}]} {
    %c16_i32 = arith.constant 16 : i32
    %0 = arith.muli %arg0, %c16_i32 : i32
    %c0_i32 = arith.constant 0 : i32
    %1 = arith.addi %0, %c0_i32 : i32
    %2 = arith.index_cast %1 : i32 to index
    %3 = memref.load %arg1[%2] : memref<16xi32, #tpu.memory_space<smem>>
    %c0_i32_0 = arith.constant 0 : i32
    %c0_i32_1 = arith.constant 0 : i32
    %4 = tpu.memref_slice %arg2[%3, %c0_i32_1] : memref<64x32xf32, #tpu.memory_space<any>> -> memref<1x32xf32, #tpu.memory_space<any>>
    %c0_i32_2 = arith.constant 0 : i32
    %c0_i32_3 = arith.constant 0 : i32
    %5 = tpu.memref_slice %arg4[%c0_i32_2, %c0_i32_3] : memref<16x32xf32, #tpu.memory_space<vmem>> -> memref<1x32xf32, #tpu.memory_space<vmem>>
    %6 = tpu.memref_slice %arg5[%c0_i32_0] : memref<16x!tpu.dma_semaphore, #tpu.memory_space<semaphore_mem>> -> memref<1x!tpu.dma_semaphore, #tpu.memory_space<semaphore_mem>>
    %7 = tpu.memref_squeeze %6 : memref<1x!tpu.dma_semaphore, #tpu.memory_space<semaphore_mem>> -> memref<!tpu.dma_semaphore, #tpu.memory_space<semaphore_mem>>
    tpu.enqueue_dma source(%4 : memref<1x32xf32, #tpu.memory_space<any>>) target(%5 : memref<1x32xf32, #tpu.memory_space<vmem>>) target_semaphore(%7 : memref<!tpu.dma_semaphore, #tpu.memory_space<semaphore_mem>>)
    %c1_i32 = arith.constant 1 : i32
    %8 = arith.addi %0, %c1_i32 : i32
    %9 = arith.index_cast %8 : i32 to index
    %10 = memref.load %arg1[%9] : memref<16xi32, #tpu.memory_space<smem>>
    %c1_i32_4 = arith.constant 1 : i32
    %c0_i32_5 = arith.constant 0 : i32
    %11 = tpu.memref_slice %arg2[%10, %c0_i32_5] : memref<64x32xf32, #tpu.memory_space<any>> -> memref<1x32xf32, #tpu.memory_space<any>>
    %c1_i32_6 = arith.constant 1 : i32
    %c0_i32_7 = arith.constant 0 : i32
    %12 = tpu.memref_slice %arg4[%c1_i32_6, %c0_i32_7] : memref<16x32xf32, #tpu.memory_space<vmem>> -> memref<1x32xf32, #tpu.memory_space<vmem>>
    %13 = tpu.memref_slice %arg5[%c1_i32_4] : memref<16x!tpu.dma_semaphore, #tpu.memory_space<semaphore_mem>> -> memref<1x!tpu.dma_semaphore, #tpu.memory_space<semaphore_mem>>
    %14 = tpu.memref_squeeze %13 : memref<1x!tpu.dma_semaphore, #tpu.memory_space<semaphore_mem>> -> memref<!tpu.dma_semaphore, #tpu.memory_space<semaphore_mem>>
    tpu.enqueue_dma source(%11 : memref<1x32xf32, #tpu.memory_space<any>>) target(%12 : memref<1x32xf32, #tpu.memory_space<vmem>>) target_semaphore(%14 : memref<!tpu.dma_semaphore, #tpu.memory_space<semaphore_mem>>)
    %c2_i32 = arith.constant 2 : i32
    %15 = arith.addi %0, %c2_i32 : i32
    %16 = arith.index_cast %15 : i32 to index
    %17 = memref.load %arg1[%16] : memref<16xi32, #tpu.memory_space<smem>>
    %c2_i32_8 = arith.constant 2 : i32
    %c0_i32_9 = arith.constant 0 : i32
    %18 = tpu.memref_slice %arg2[%17, %c0_i32_9] : memref<64x32xf32, #tpu.memory_space<any>> -> memref<1x32xf32, #tpu.memory_space<any>>
    %c2_i32_10 = arith.constant 2 : i32
    %c0_i32_11 = arith.constant 0 : i32
    %19 = tpu.memref_slice %arg4[%c2_i32_10, %c0_i32_11] : memref<16x32xf32, #tpu.memory_space<vmem>> -> memref<1x32xf32, #tpu.memory_space<vmem>>
    %20 = tpu.memref_slice %arg5[%c2_i32_8] : memref<16x!tpu.dma_semaphore, #tpu.memory_space<semaphore_mem>> -> memref<1x!tpu.dma_semaphore, #tpu.memory_space<semaphore_mem>>
    %21 = tpu.memref_squeeze %20 : memref<1x!tpu.dma_semaphore, #tpu.memory_space<semaphore_mem>> -> memref<!tpu.dma_semaphore, #tpu.memory_space<semaphore_mem>>
    tpu.enqueue_dma source(%18 : memref<1x32xf32, #tpu.memory_space<any>>) target(%19 : memref<1x32xf32, #tpu.memory_space<vmem>>) target_semaphore(%21 : memref<!tpu.dma_semaphore, #tpu.memory_space<semaphore_mem>>)
    %c3_i32 = arith.constant 3 : i32
    %22 = arith.addi %0, %c3_i32 : i32
    %23 = arith.index_cast %22 : i32 to index
    %24 = memref.load %arg1[%23] : memref<16xi32, #tpu.memory_space<smem>>
    %c3_i32_12 = arith.constant 3 : i32
    %c0_i32_13 = arith.constant 0 : i32
    %25 = tpu.memref_slice %arg2[%24, %c0_i32_13] : memref<64x32xf32, #tpu.memory_space<any>> -> memref<1x32xf32, #tpu.memory_space<any>>
    %c3_i32_14 = arith.constant 3 : i32
    %c0_i32_15 = arith.constant 0 : i32
    %26 = tpu.memref_slice %arg4[%c3_i32_14, %c0_i32_15] : memref<16x32xf32, #tpu.memory_space<vmem>> -> memref<1x32xf32, #tpu.memory_space<vmem>>
    %27 = tpu.memref_slice %arg5[%c3_i32_12] : memref<16x!tpu.dma_semaphore, #tpu.memory_space<semaphore_mem>> -> memref<1x!tpu.dma_semaphore, #tpu.memory_space<semaphore_mem>>
    %28 = tpu.memref_squeeze %27 : memref<1x!tpu.dma_semaphore, #tpu.memory_space<semaphore_mem>> -> memref<!tpu.dma_semaphore, #tpu.memory_space<semaphore_mem>>
    tpu.enqueue_dma source(%25 : memref<1x32xf32, #tpu.memory_space<any>>) target(%26 : memref<1x32xf32, #tpu.memory_space<vmem>>) target_semaphore(%28 : memref<!tpu.dma_semaphore, #tpu.memory_space<semaphore_mem>>)
    %c4_i32 = arith.constant 4 : i32
    %29 = arith.addi %0, %c4_i32 : i32
    %30 = arith.index_cast %29 : i32 to index
    %31 = memref.load %arg1[%30] : memref<16xi32, #tpu.memory_space<smem>>
    %c4_i32_16 = arith.constant 4 : i32
    %c0_i32_17 = arith.constant 0 : i32
    %32 = tpu.memref_slice %arg2[%31, %c0_i32_17] : memref<64x32xf32, #tpu.memory_space<any>> -> memref<1x32xf32, #tpu.memory_space<any>>
    %c4_i32_18 = arith.constant 4 : i32
    %c0_i32_19 = arith.constant 0 : i32
    %33 = tpu.memref_slice %arg4[%c4_i32_18, %c0_i32_19] : memref<16x32xf32, #tpu.memory_space<vmem>> -> memref<1x32xf32, #tpu.memory_space<vmem>>
    %34 = tpu.memref_slice %arg5[%c4_i32_16] : memref<16x!tpu.dma_semaphore, #tpu.memory_space<semaphore_mem>> -> memref<1x!tpu.dma_semaphore, #tpu.memory_space<semaphore_mem>>
    %35 = tpu.memref_squeeze %34 : memref<1x!tpu.dma_semaphore, #tpu.memory_space<semaphore_mem>> -> memref<!tpu.dma_semaphore, #tpu.memory_space<semaphore_mem>>
    tpu.enqueue_dma source(%32 : memref<1x32xf32, #tpu.memory_space<any>>) target(%33 : memref<1x32xf32, #tpu.memory_space<vmem>>) target_semaphore(%35 : memref<!tpu.dma_semaphore, #tpu.memory_space<semaphore_mem>>)
    %c5_i32 = arith.constant 5 : i32
    %36 = arith.addi %0, %c5_i32 : i32
    %37 = arith.index_cast %36 : i32 to index
    %38 = memref.load %arg1[%37] : memref<16xi32, #tpu.memory_space<smem>>
    %c5_i32_20 = arith.constant 5 : i32
    %c0_i32_21 = arith.constant 0 : i32
    %39 = tpu.memref_slice %arg2[%38, %c0_i32_21] : memref<64x32xf32, #tpu.memory_space<any>> -> memref<1x32xf32, #tpu.memory_space<any>>
    %c5_i32_22 = arith.constant 5 : i32
    %c0_i32_23 = arith.constant 0 : i32
    %40 = tpu.memref_slice %arg4[%c5_i32_22, %c0_i32_23] : memref<16x32xf32, #tpu.memory_space<vmem>> -> memref<1x32xf32, #tpu.memory_space<vmem>>
    %41 = tpu.memref_slice %arg5[%c5_i32_20] : memref<16x!tpu.dma_semaphore, #tpu.memory_space<semaphore_mem>> -> memref<1x!tpu.dma_semaphore, #tpu.memory_space<semaphore_mem>>
    %42 = tpu.memref_squeeze %41 : memref<1x!tpu.dma_semaphore, #tpu.memory_space<semaphore_mem>> -> memref<!tpu.dma_semaphore, #tpu.memory_space<semaphore_mem>>
    tpu.enqueue_dma source(%39 : memref<1x32xf32, #tpu.memory_space<any>>) target(%40 : memref<1x32xf32, #tpu.memory_space<vmem>>) target_semaphore(%42 : memref<!tpu.dma_semaphore, #tpu.memory_space<semaphore_mem>>)
    %c6_i32 = arith.constant 6 : i32
    %43 = arith.addi %0, %c6_i32 : i32
    %44 = arith.index_cast %43 : i32 to index
    %45 = memref.load %arg1[%44] : memref<16xi32, #tpu.memory_space<smem>>
    %c6_i32_24 = arith.constant 6 : i32
    %c0_i32_25 = arith.constant 0 : i32
    %46 = tpu.memref_slice %arg2[%45, %c0_i32_25] : memref<64x32xf32, #tpu.memory_space<any>> -> memref<1x32xf32, #tpu.memory_space<any>>
    %c6_i32_26 = arith.constant 6 : i32
    %c0_i32_27 = arith.constant 0 : i32
    %47 = tpu.memref_slice %arg4[%c6_i32_26, %c0_i32_27] : memref<16x32xf32, #tpu.memory_space<vmem>> -> memref<1x32xf32, #tpu.memory_space<vmem>>
    %48 = tpu.memref_slice %arg5[%c6_i32_24] : memref<16x!tpu.dma_semaphore, #tpu.memory_space<semaphore_mem>> -> memref<1x!tpu.dma_semaphore, #tpu.memory_space<semaphore_mem>>
    %49 = tpu.memref_squeeze %48 : memref<1x!tpu.dma_semaphore, #tpu.memory_space<semaphore_mem>> -> memref<!tpu.dma_semaphore, #tpu.memory_space<semaphore_mem>>
    tpu.enqueue_dma source(%46 : memref<1x32xf32, #tpu.memory_space<any>>) target(%47 : memref<1x32xf32, #tpu.memory_space<vmem>>) target_semaphore(%49 : memref<!tpu.dma_semaphore, #tpu.memory_space<semaphore_mem>>)
    %c7_i32 = arith.constant 7 : i32
    %50 = arith.addi %0, %c7_i32 : i32
    %51 = arith.index_cast %50 : i32 to index
    %52 = memref.load %arg1[%51] : memref<16xi32, #tpu.memory_space<smem>>
    %c7_i32_28 = arith.constant 7 : i32
    %c0_i32_29 = arith.constant 0 : i32
    %53 = tpu.memref_slice %arg2[%52, %c0_i32_29] : memref<64x32xf32, #tpu.memory_space<any>> -> memref<1x32xf32, #tpu.memory_space<any>>
    %c7_i32_30 = arith.constant 7 : i32
    %c0_i32_31 = arith.constant 0 : i32
    %54 = tpu.memref_slice %arg4[%c7_i32_30, %c0_i32_31] : memref<16x32xf32, #tpu.memory_space<vmem>> -> memref<1x32xf32, #tpu.memory_space<vmem>>
    %55 = tpu.memref_slice %arg5[%c7_i32_28] : memref<16x!tpu.dma_semaphore, #tpu.memory_space<semaphore_mem>> -> memref<1x!tpu.dma_semaphore, #tpu.memory_space<semaphore_mem>>
    %56 = tpu.memref_squeeze %55 : memref<1x!tpu.dma_semaphore, #tpu.memory_space<semaphore_mem>> -> memref<!tpu.dma_semaphore, #tpu.memory_space<semaphore_mem>>
    tpu.enqueue_dma source(%53 : memref<1x32xf32, #tpu.memory_space<any>>) target(%54 : memref<1x32xf32, #tpu.memory_space<vmem>>) target_semaphore(%56 : memref<!tpu.dma_semaphore, #tpu.memory_space<semaphore_mem>>)
    %c8_i32 = arith.constant 8 : i32
    %57 = arith.addi %0, %c8_i32 : i32
    %58 = arith.index_cast %57 : i32 to index
    %59 = memref.load %arg1[%58] : memref<16xi32, #tpu.memory_space<smem>>
    %c8_i32_32 = arith.constant 8 : i32
    %c0_i32_33 = arith.constant 0 : i32
    %60 = tpu.memref_slice %arg2[%59, %c0_i32_33] : memref<64x32xf32, #tpu.memory_space<any>> -> memref<1x32xf32, #tpu.memory_space<any>>
    %c8_i32_34 = arith.constant 8 : i32
    %c0_i32_35 = arith.constant 0 : i32
    %61 = tpu.memref_slice %arg4[%c8_i32_34, %c0_i32_35] : memref<16x32xf32, #tpu.memory_space<vmem>> -> memref<1x32xf32, #tpu.memory_space<vmem>>
    %62 = tpu.memref_slice %arg5[%c8_i32_32] : memref<16x!tpu.dma_semaphore, #tpu.memory_space<semaphore_mem>> -> memref<1x!tpu.dma_semaphore, #tpu.memory_space<semaphore_mem>>
    %63 = tpu.memref_squeeze %62 : memref<1x!tpu.dma_semaphore, #tpu.memory_space<semaphore_mem>> -> memref<!tpu.dma_semaphore, #tpu.memory_space<semaphore_mem>>
    tpu.enqueue_dma source(%60 : memref<1x32xf32, #tpu.memory_space<any>>) target(%61 : memref<1x32xf32, #tpu.memory_space<vmem>>) target_semaphore(%63 : memref<!tpu.dma_semaphore, #tpu.memory_space<semaphore_mem>>)
    %c9_i32 = arith.constant 9 : i32
    %64 = arith.addi %0, %c9_i32 : i32
    %65 = arith.index_cast %64 : i32 to index
    %66 = memref.load %arg1[%65] : memref<16xi32, #tpu.memory_space<smem>>
    %c9_i32_36 = arith.constant 9 : i32
    %c0_i32_37 = arith.constant 0 : i32
    %67 = tpu.memref_slice %arg2[%66, %c0_i32_37] : memref<64x32xf32, #tpu.memory_space<any>> -> memref<1x32xf32, #tpu.memory_space<any>>
    %c9_i32_38 = arith.constant 9 : i32
    %c0_i32_39 = arith.constant 0 : i32
    %68 = tpu.memref_slice %arg4[%c9_i32_38, %c0_i32_39] : memref<16x32xf32, #tpu.memory_space<vmem>> -> memref<1x32xf32, #tpu.memory_space<vmem>>
    %69 = tpu.memref_slice %arg5[%c9_i32_36] : memref<16x!tpu.dma_semaphore, #tpu.memory_space<semaphore_mem>> -> memref<1x!tpu.dma_semaphore, #tpu.memory_space<semaphore_mem>>
    %70 = tpu.memref_squeeze %69 : memref<1x!tpu.dma_semaphore, #tpu.memory_space<semaphore_mem>> -> memref<!tpu.dma_semaphore, #tpu.memory_space<semaphore_mem>>
    tpu.enqueue_dma source(%67 : memref<1x32xf32, #tpu.memory_space<any>>) target(%68 : memref<1x32xf32, #tpu.memory_space<vmem>>) target_semaphore(%70 : memref<!tpu.dma_semaphore, #tpu.memory_space<semaphore_mem>>)
    %c10_i32 = arith.constant 10 : i32
    %71 = arith.addi %0, %c10_i32 : i32
    %72 = arith.index_cast %71 : i32 to index
    %73 = memref.load %arg1[%72] : memref<16xi32, #tpu.memory_space<smem>>
    %c10_i32_40 = arith.constant 10 : i32
    %c0_i32_41 = arith.constant 0 : i32
    %74 = tpu.memref_slice %arg2[%73, %c0_i32_41] : memref<64x32xf32, #tpu.memory_space<any>> -> memref<1x32xf32, #tpu.memory_space<any>>
    %c10_i32_42 = arith.constant 10 : i32
    %c0_i32_43 = arith.constant 0 : i32
    %75 = tpu.memref_slice %arg4[%c10_i32_42, %c0_i32_43] : memref<16x32xf32, #tpu.memory_space<vmem>> -> memref<1x32xf32, #tpu.memory_space<vmem>>
    %76 = tpu.memref_slice %arg5[%c10_i32_40] : memref<16x!tpu.dma_semaphore, #tpu.memory_space<semaphore_mem>> -> memref<1x!tpu.dma_semaphore, #tpu.memory_space<semaphore_mem>>
    %77 = tpu.memref_squeeze %76 : memref<1x!tpu.dma_semaphore, #tpu.memory_space<semaphore_mem>> -> memref<!tpu.dma_semaphore, #tpu.memory_space<semaphore_mem>>
    tpu.enqueue_dma source(%74 : memref<1x32xf32, #tpu.memory_space<any>>) target(%75 : memref<1x32xf32, #tpu.memory_space<vmem>>) target_semaphore(%77 : memref<!tpu.dma_semaphore, #tpu.memory_space<semaphore_mem>>)
    %c11_i32 = arith.constant 11 : i32
    %78 = arith.addi %0, %c11_i32 : i32
    %79 = arith.index_cast %78 : i32 to index
    %80 = memref.load %arg1[%79] : memref<16xi32, #tpu.memory_space<smem>>
    %c11_i32_44 = arith.constant 11 : i32
    %c0_i32_45 = arith.constant 0 : i32
    %81 = tpu.memref_slice %arg2[%80, %c0_i32_45] : memref<64x32xf32, #tpu.memory_space<any>> -> memref<1x32xf32, #tpu.memory_space<any>>
    %c11_i32_46 = arith.constant 11 : i32
    %c0_i32_47 = arith.constant 0 : i32
    %82 = tpu.memref_slice %arg4[%c11_i32_46, %c0_i32_47] : memref<16x32xf32, #tpu.memory_space<vmem>> -> memref<1x32xf32, #tpu.memory_space<vmem>>
    %83 = tpu.memref_slice %arg5[%c11_i32_44] : memref<16x!tpu.dma_semaphore, #tpu.memory_space<semaphore_mem>> -> memref<1x!tpu.dma_semaphore, #tpu.memory_space<semaphore_mem>>
    %84 = tpu.memref_squeeze %83 : memref<1x!tpu.dma_semaphore, #tpu.memory_space<semaphore_mem>> -> memref<!tpu.dma_semaphore, #tpu.memory_space<semaphore_mem>>
    tpu.enqueue_dma source(%81 : memref<1x32xf32, #tpu.memory_space<any>>) target(%82 : memref<1x32xf32, #tpu.memory_space<vmem>>) target_semaphore(%84 : memref<!tpu.dma_semaphore, #tpu.memory_space<semaphore_mem>>)
    %c12_i32 = arith.constant 12 : i32
    %85 = arith.addi %0, %c12_i32 : i32
    %86 = arith.index_cast %85 : i32 to index
    %87 = memref.load %arg1[%86] : memref<16xi32, #tpu.memory_space<smem>>
    %c12_i32_48 = arith.constant 12 : i32
    %c0_i32_49 = arith.constant 0 : i32
    %88 = tpu.memref_slice %arg2[%87, %c0_i32_49] : memref<64x32xf32, #tpu.memory_space<any>> -> memref<1x32xf32, #tpu.memory_space<any>>
    %c12_i32_50 = arith.constant 12 : i32
    %c0_i32_51 = arith.constant 0 : i32
    %89 = tpu.memref_slice %arg4[%c12_i32_50, %c0_i32_51] : memref<16x32xf32, #tpu.memory_space<vmem>> -> memref<1x32xf32, #tpu.memory_space<vmem>>
    %90 = tpu.memref_slice %arg5[%c12_i32_48] : memref<16x!tpu.dma_semaphore, #tpu.memory_space<semaphore_mem>> -> memref<1x!tpu.dma_semaphore, #tpu.memory_space<semaphore_mem>>
    %91 = tpu.memref_squeeze %90 : memref<1x!tpu.dma_semaphore, #tpu.memory_space<semaphore_mem>> -> memref<!tpu.dma_semaphore, #tpu.memory_space<semaphore_mem>>
    tpu.enqueue_dma source(%88 : memref<1x32xf32, #tpu.memory_space<any>>) target(%89 : memref<1x32xf32, #tpu.memory_space<vmem>>) target_semaphore(%91 : memref<!tpu.dma_semaphore, #tpu.memory_space<semaphore_mem>>)
    %c13_i32 = arith.constant 13 : i32
    %92 = arith.addi %0, %c13_i32 : i32
    %93 = arith.index_cast %92 : i32 to index
    %94 = memref.load %arg1[%93] : memref<16xi32, #tpu.memory_space<smem>>
    %c13_i32_52 = arith.constant 13 : i32
    %c0_i32_53 = arith.constant 0 : i32
    %95 = tpu.memref_slice %arg2[%94, %c0_i32_53] : memref<64x32xf32, #tpu.memory_space<any>> -> memref<1x32xf32, #tpu.memory_space<any>>
    %c13_i32_54 = arith.constant 13 : i32
    %c0_i32_55 = arith.constant 0 : i32
    %96 = tpu.memref_slice %arg4[%c13_i32_54, %c0_i32_55] : memref<16x32xf32, #tpu.memory_space<vmem>> -> memref<1x32xf32, #tpu.memory_space<vmem>>
    %97 = tpu.memref_slice %arg5[%c13_i32_52] : memref<16x!tpu.dma_semaphore, #tpu.memory_space<semaphore_mem>> -> memref<1x!tpu.dma_semaphore, #tpu.memory_space<semaphore_mem>>
    %98 = tpu.memref_squeeze %97 : memref<1x!tpu.dma_semaphore, #tpu.memory_space<semaphore_mem>> -> memref<!tpu.dma_semaphore, #tpu.memory_space<semaphore_mem>>
    tpu.enqueue_dma source(%95 : memref<1x32xf32, #tpu.memory_space<any>>) target(%96 : memref<1x32xf32, #tpu.memory_space<vmem>>) target_semaphore(%98 : memref<!tpu.dma_semaphore, #tpu.memory_space<semaphore_mem>>)
    %c14_i32 = arith.constant 14 : i32
    %99 = arith.addi %0, %c14_i32 : i32
    %100 = arith.index_cast %99 : i32 to index
    %101 = memref.load %arg1[%100] : memref<16xi32, #tpu.memory_space<smem>>
    %c14_i32_56 = arith.constant 14 : i32
    %c0_i32_57 = arith.constant 0 : i32
    %102 = tpu.memref_slice %arg2[%101, %c0_i32_57] : memref<64x32xf32, #tpu.memory_space<any>> -> memref<1x32xf32, #tpu.memory_space<any>>
    %c14_i32_58 = arith.constant 14 : i32
    %c0_i32_59 = arith.constant 0 : i32
    %103 = tpu.memref_slice %arg4[%c14_i32_58, %c0_i32_59] : memref<16x32xf32, #tpu.memory_space<vmem>> -> memref<1x32xf32, #tpu.memory_space<vmem>>
    %104 = tpu.memref_slice %arg5[%c14_i32_56] : memref<16x!tpu.dma_semaphore, #tpu.memory_space<semaphore_mem>> -> memref<1x!tpu.dma_semaphore, #tpu.memory_space<semaphore_mem>>
    %105 = tpu.memref_squeeze %104 : memref<1x!tpu.dma_semaphore, #tpu.memory_space<semaphore_mem>> -> memref<!tpu.dma_semaphore, #tpu.memory_space<semaphore_mem>>
    tpu.enqueue_dma source(%102 : memref<1x32xf32, #tpu.memory_space<any>>) target(%103 : memref<1x32xf32, #tpu.memory_space<vmem>>) target_semaphore(%105 : memref<!tpu.dma_semaphore, #tpu.memory_space<semaphore_mem>>)
    %c15_i32 = arith.constant 15 : i32
    %106 = arith.addi %0, %c15_i32 : i32
    %107 = arith.index_cast %106 : i32 to index
    %108 = memref.load %arg1[%107] : memref<16xi32, #tpu.memory_space<smem>>
    %c15_i32_60 = arith.constant 15 : i32
    %c0_i32_61 = arith.constant 0 : i32
    %109 = tpu.memref_slice %arg2[%108, %c0_i32_61] : memref<64x32xf32, #tpu.memory_space<any>> -> memref<1x32xf32, #tpu.memory_space<any>>
    %c15_i32_62 = arith.constant 15 : i32
    %c0_i32_63 = arith.constant 0 : i32
    %110 = tpu.memref_slice %arg4[%c15_i32_62, %c0_i32_63] : memref<16x32xf32, #tpu.memory_space<vmem>> -> memref<1x32xf32, #tpu.memory_space<vmem>>
    %111 = tpu.memref_slice %arg5[%c15_i32_60] : memref<16x!tpu.dma_semaphore, #tpu.memory_space<semaphore_mem>> -> memref<1x!tpu.dma_semaphore, #tpu.memory_space<semaphore_mem>>
    %112 = tpu.memref_squeeze %111 : memref<1x!tpu.dma_semaphore, #tpu.memory_space<semaphore_mem>> -> memref<!tpu.dma_semaphore, #tpu.memory_space<semaphore_mem>>
    tpu.enqueue_dma source(%109 : memref<1x32xf32, #tpu.memory_space<any>>) target(%110 : memref<1x32xf32, #tpu.memory_space<vmem>>) target_semaphore(%112 : memref<!tpu.dma_semaphore, #tpu.memory_space<semaphore_mem>>)
    %c0_i32_64 = arith.constant 0 : i32
    %c0_i32_65 = arith.constant 0 : i32
    %c0_i32_66 = arith.constant 0 : i32
    %113 = tpu.memref_slice %arg2[%c0_i32_65, %c0_i32_66] : memref<64x32xf32, #tpu.memory_space<any>> -> memref<1x32xf32, #tpu.memory_space<any>>
    %c0_i32_67 = arith.constant 0 : i32
    %c0_i32_68 = arith.constant 0 : i32
    %114 = tpu.memref_slice %arg4[%c0_i32_67, %c0_i32_68] : memref<16x32xf32, #tpu.memory_space<vmem>> -> memref<1x32xf32, #tpu.memory_space<vmem>>
    %115 = tpu.memref_slice %arg5[%c0_i32_64] : memref<16x!tpu.dma_semaphore, #tpu.memory_space<semaphore_mem>> -> memref<1x!tpu.dma_semaphore, #tpu.memory_space<semaphore_mem>>
    %116 = tpu.memref_squeeze %115 : memref<1x!tpu.dma_semaphore, #tpu.memory_space<semaphore_mem>> -> memref<!tpu.dma_semaphore, #tpu.memory_space<semaphore_mem>>
    tpu.wait_dma2 semaphore(%116 : memref<!tpu.dma_semaphore, #tpu.memory_space<semaphore_mem>>) src(%113 : memref<1x32xf32, #tpu.memory_space<any>>) dst(%114 : memref<1x32xf32, #tpu.memory_space<vmem>>)
    %c1_i32_69 = arith.constant 1 : i32
    %c0_i32_70 = arith.constant 0 : i32
    %c0_i32_71 = arith.constant 0 : i32
    %117 = tpu.memref_slice %arg2[%c0_i32_70, %c0_i32_71] : memref<64x32xf32, #tpu.memory_space<any>> -> memref<1x32xf32, #tpu.memory_space<any>>
    %c1_i32_72 = arith.constant 1 : i32
    %c0_i32_73 = arith.constant 0 : i32
    %118 = tpu.memref_slice %arg4[%c1_i32_72, %c0_i32_73] : memref<16x32xf32, #tpu.memory_space<vmem>> -> memref<1x32xf32, #tpu.memory_space<vmem>>
    %119 = tpu.memref_slice %arg5[%c1_i32_69] : memref<16x!tpu.dma_semaphore, #tpu.memory_space<semaphore_mem>> -> memref<1x!tpu.dma_semaphore, #tpu.memory_space<semaphore_mem>>
    %120 = tpu.memref_squeeze %119 : memref<1x!tpu.dma_semaphore, #tpu.memory_space<semaphore_mem>> -> memref<!tpu.dma_semaphore, #tpu.memory_space<semaphore_mem>>
    tpu.wait_dma2 semaphore(%120 : memref<!tpu.dma_semaphore, #tpu.memory_space<semaphore_mem>>) src(%117 : memref<1x32xf32, #tpu.memory_space<any>>) dst(%118 : memref<1x32xf32, #tpu.memory_space<vmem>>)
    %c2_i32_74 = arith.constant 2 : i32
    %c0_i32_75 = arith.constant 0 : i32
    %c0_i32_76 = arith.constant 0 : i32
    %121 = tpu.memref_slice %arg2[%c0_i32_75, %c0_i32_76] : memref<64x32xf32, #tpu.memory_space<any>> -> memref<1x32xf32, #tpu.memory_space<any>>
    %c2_i32_77 = arith.constant 2 : i32
    %c0_i32_78 = arith.constant 0 : i32
    %122 = tpu.memref_slice %arg4[%c2_i32_77, %c0_i32_78] : memref<16x32xf32, #tpu.memory_space<vmem>> -> memref<1x32xf32, #tpu.memory_space<vmem>>
    %123 = tpu.memref_slice %arg5[%c2_i32_74] : memref<16x!tpu.dma_semaphore, #tpu.memory_space<semaphore_mem>> -> memref<1x!tpu.dma_semaphore, #tpu.memory_space<semaphore_mem>>
    %124 = tpu.memref_squeeze %123 : memref<1x!tpu.dma_semaphore, #tpu.memory_space<semaphore_mem>> -> memref<!tpu.dma_semaphore, #tpu.memory_space<semaphore_mem>>
    tpu.wait_dma2 semaphore(%124 : memref<!tpu.dma_semaphore, #tpu.memory_space<semaphore_mem>>) src(%121 : memref<1x32xf32, #tpu.memory_space<any>>) dst(%122 : memref<1x32xf32, #tpu.memory_space<vmem>>)
    %c3_i32_79 = arith.constant 3 : i32
    %c0_i32_80 = arith.constant 0 : i32
    %c0_i32_81 = arith.constant 0 : i32
    %125 = tpu.memref_slice %arg2[%c0_i32_80, %c0_i32_81] : memref<64x32xf32, #tpu.memory_space<any>> -> memref<1x32xf32, #tpu.memory_space<any>>
    %c3_i32_82 = arith.constant 3 : i32
    %c0_i32_83 = arith.constant 0 : i32
    %126 = tpu.memref_slice %arg4[%c3_i32_82, %c0_i32_83] : memref<16x32xf32, #tpu.memory_space<vmem>> -> memref<1x32xf32, #tpu.memory_space<vmem>>
    %127 = tpu.memref_slice %arg5[%c3_i32_79] : memref<16x!tpu.dma_semaphore, #tpu.memory_space<semaphore_mem>> -> memref<1x!tpu.dma_semaphore, #tpu.memory_space<semaphore_mem>>
    %128 = tpu.memref_squeeze %127 : memref<1x!tpu.dma_semaphore, #tpu.memory_space<semaphore_mem>> -> memref<!tpu.dma_semaphore, #tpu.memory_space<semaphore_mem>>
    tpu.wait_dma2 semaphore(%128 : memref<!tpu.dma_semaphore, #tpu.memory_space<semaphore_mem>>) src(%125 : memref<1x32xf32, #tpu.memory_space<any>>) dst(%126 : memref<1x32xf32, #tpu.memory_space<vmem>>)
    %c4_i32_84 = arith.constant 4 : i32
    %c0_i32_85 = arith.constant 0 : i32
    %c0_i32_86 = arith.constant 0 : i32
    %129 = tpu.memref_slice %arg2[%c0_i32_85, %c0_i32_86] : memref<64x32xf32, #tpu.memory_space<any>> -> memref<1x32xf32, #tpu.memory_space<any>>
    %c4_i32_87 = arith.constant 4 : i32
    %c0_i32_88 = arith.constant 0 : i32
    %130 = tpu.memref_slice %arg4[%c4_i32_87, %c0_i32_88] : memref<16x32xf32, #tpu.memory_space<vmem>> -> memref<1x32xf32, #tpu.memory_space<vmem>>
    %131 = tpu.memref_slice %arg5[%c4_i32_84] : memref<16x!tpu.dma_semaphore, #tpu.memory_space<semaphore_mem>> -> memref<1x!tpu.dma_semaphore, #tpu.memory_space<semaphore_mem>>
    %132 = tpu.memref_squeeze %131 : memref<1x!tpu.dma_semaphore, #tpu.memory_space<semaphore_mem>> -> memref<!tpu.dma_semaphore, #tpu.memory_space<semaphore_mem>>
    tpu.wait_dma2 semaphore(%132 : memref<!tpu.dma_semaphore, #tpu.memory_space<semaphore_mem>>) src(%129 : memref<1x32xf32, #tpu.memory_space<any>>) dst(%130 : memref<1x32xf32, #tpu.memory_space<vmem>>)
    %c5_i32_89 = arith.constant 5 : i32
    %c0_i32_90 = arith.constant 0 : i32
    %c0_i32_91 = arith.constant 0 : i32
    %133 = tpu.memref_slice %arg2[%c0_i32_90, %c0_i32_91] : memref<64x32xf32, #tpu.memory_space<any>> -> memref<1x32xf32, #tpu.memory_space<any>>
    %c5_i32_92 = arith.constant 5 : i32
    %c0_i32_93 = arith.constant 0 : i32
    %134 = tpu.memref_slice %arg4[%c5_i32_92, %c0_i32_93] : memref<16x32xf32, #tpu.memory_space<vmem>> -> memref<1x32xf32, #tpu.memory_space<vmem>>
    %135 = tpu.memref_slice %arg5[%c5_i32_89] : memref<16x!tpu.dma_semaphore, #tpu.memory_space<semaphore_mem>> -> memref<1x!tpu.dma_semaphore, #tpu.memory_space<semaphore_mem>>
    %136 = tpu.memref_squeeze %135 : memref<1x!tpu.dma_semaphore, #tpu.memory_space<semaphore_mem>> -> memref<!tpu.dma_semaphore, #tpu.memory_space<semaphore_mem>>
    tpu.wait_dma2 semaphore(%136 : memref<!tpu.dma_semaphore, #tpu.memory_space<semaphore_mem>>) src(%133 : memref<1x32xf32, #tpu.memory_space<any>>) dst(%134 : memref<1x32xf32, #tpu.memory_space<vmem>>)
    %c6_i32_94 = arith.constant 6 : i32
    %c0_i32_95 = arith.constant 0 : i32
    %c0_i32_96 = arith.constant 0 : i32
    %137 = tpu.memref_slice %arg2[%c0_i32_95, %c0_i32_96] : memref<64x32xf32, #tpu.memory_space<any>> -> memref<1x32xf32, #tpu.memory_space<any>>
    %c6_i32_97 = arith.constant 6 : i32
    %c0_i32_98 = arith.constant 0 : i32
    %138 = tpu.memref_slice %arg4[%c6_i32_97, %c0_i32_98] : memref<16x32xf32, #tpu.memory_space<vmem>> -> memref<1x32xf32, #tpu.memory_space<vmem>>
    %139 = tpu.memref_slice %arg5[%c6_i32_94] : memref<16x!tpu.dma_semaphore, #tpu.memory_space<semaphore_mem>> -> memref<1x!tpu.dma_semaphore, #tpu.memory_space<semaphore_mem>>
    %140 = tpu.memref_squeeze %139 : memref<1x!tpu.dma_semaphore, #tpu.memory_space<semaphore_mem>> -> memref<!tpu.dma_semaphore, #tpu.memory_space<semaphore_mem>>
    tpu.wait_dma2 semaphore(%140 : memref<!tpu.dma_semaphore, #tpu.memory_space<semaphore_mem>>) src(%137 : memref<1x32xf32, #tpu.memory_space<any>>) dst(%138 : memref<1x32xf32, #tpu.memory_space<vmem>>)
    %c7_i32_99 = arith.constant 7 : i32
    %c0_i32_100 = arith.constant 0 : i32
    %c0_i32_101 = arith.constant 0 : i32
    %141 = tpu.memref_slice %arg2[%c0_i32_100, %c0_i32_101] : memref<64x32xf32, #tpu.memory_space<any>> -> memref<1x32xf32, #tpu.memory_space<any>>
    %c7_i32_102 = arith.constant 7 : i32
    %c0_i32_103 = arith.constant 0 : i32
    %142 = tpu.memref_slice %arg4[%c7_i32_102, %c0_i32_103] : memref<16x32xf32, #tpu.memory_space<vmem>> -> memref<1x32xf32, #tpu.memory_space<vmem>>
    %143 = tpu.memref_slice %arg5[%c7_i32_99] : memref<16x!tpu.dma_semaphore, #tpu.memory_space<semaphore_mem>> -> memref<1x!tpu.dma_semaphore, #tpu.memory_space<semaphore_mem>>
    %144 = tpu.memref_squeeze %143 : memref<1x!tpu.dma_semaphore, #tpu.memory_space<semaphore_mem>> -> memref<!tpu.dma_semaphore, #tpu.memory_space<semaphore_mem>>
    tpu.wait_dma2 semaphore(%144 : memref<!tpu.dma_semaphore, #tpu.memory_space<semaphore_mem>>) src(%141 : memref<1x32xf32, #tpu.memory_space<any>>) dst(%142 : memref<1x32xf32, #tpu.memory_space<vmem>>)
    %c8_i32_104 = arith.constant 8 : i32
    %c0_i32_105 = arith.constant 0 : i32
    %c0_i32_106 = arith.constant 0 : i32
    %145 = tpu.memref_slice %arg2[%c0_i32_105, %c0_i32_106] : memref<64x32xf32, #tpu.memory_space<any>> -> memref<1x32xf32, #tpu.memory_space<any>>
    %c8_i32_107 = arith.constant 8 : i32
    %c0_i32_108 = arith.constant 0 : i32
    %146 = tpu.memref_slice %arg4[%c8_i32_107, %c0_i32_108] : memref<16x32xf32, #tpu.memory_space<vmem>> -> memref<1x32xf32, #tpu.memory_space<vmem>>
    %147 = tpu.memref_slice %arg5[%c8_i32_104] : memref<16x!tpu.dma_semaphore, #tpu.memory_space<semaphore_mem>> -> memref<1x!tpu.dma_semaphore, #tpu.memory_space<semaphore_mem>>
    %148 = tpu.memref_squeeze %147 : memref<1x!tpu.dma_semaphore, #tpu.memory_space<semaphore_mem>> -> memref<!tpu.dma_semaphore, #tpu.memory_space<semaphore_mem>>
    tpu.wait_dma2 semaphore(%148 : memref<!tpu.dma_semaphore, #tpu.memory_space<semaphore_mem>>) src(%145 : memref<1x32xf32, #tpu.memory_space<any>>) dst(%146 : memref<1x32xf32, #tpu.memory_space<vmem>>)
    %c9_i32_109 = arith.constant 9 : i32
    %c0_i32_110 = arith.constant 0 : i32
    %c0_i32_111 = arith.constant 0 : i32
    %149 = tpu.memref_slice %arg2[%c0_i32_110, %c0_i32_111] : memref<64x32xf32, #tpu.memory_space<any>> -> memref<1x32xf32, #tpu.memory_space<any>>
    %c9_i32_112 = arith.constant 9 : i32
    %c0_i32_113 = arith.constant 0 : i32
    %150 = tpu.memref_slice %arg4[%c9_i32_112, %c0_i32_113] : memref<16x32xf32, #tpu.memory_space<vmem>> -> memref<1x32xf32, #tpu.memory_space<vmem>>
    %151 = tpu.memref_slice %arg5[%c9_i32_109] : memref<16x!tpu.dma_semaphore, #tpu.memory_space<semaphore_mem>> -> memref<1x!tpu.dma_semaphore, #tpu.memory_space<semaphore_mem>>
    %152 = tpu.memref_squeeze %151 : memref<1x!tpu.dma_semaphore, #tpu.memory_space<semaphore_mem>> -> memref<!tpu.dma_semaphore, #tpu.memory_space<semaphore_mem>>
    tpu.wait_dma2 semaphore(%152 : memref<!tpu.dma_semaphore, #tpu.memory_space<semaphore_mem>>) src(%149 : memref<1x32xf32, #tpu.memory_space<any>>) dst(%150 : memref<1x32xf32, #tpu.memory_space<vmem>>)
    %c10_i32_114 = arith.constant 10 : i32
    %c0_i32_115 = arith.constant 0 : i32
    %c0_i32_116 = arith.constant 0 : i32
    %153 = tpu.memref_slice %arg2[%c0_i32_115, %c0_i32_116] : memref<64x32xf32, #tpu.memory_space<any>> -> memref<1x32xf32, #tpu.memory_space<any>>
    %c10_i32_117 = arith.constant 10 : i32
    %c0_i32_118 = arith.constant 0 : i32
    %154 = tpu.memref_slice %arg4[%c10_i32_117, %c0_i32_118] : memref<16x32xf32, #tpu.memory_space<vmem>> -> memref<1x32xf32, #tpu.memory_space<vmem>>
    %155 = tpu.memref_slice %arg5[%c10_i32_114] : memref<16x!tpu.dma_semaphore, #tpu.memory_space<semaphore_mem>> -> memref<1x!tpu.dma_semaphore, #tpu.memory_space<semaphore_mem>>
    %156 = tpu.memref_squeeze %155 : memref<1x!tpu.dma_semaphore, #tpu.memory_space<semaphore_mem>> -> memref<!tpu.dma_semaphore, #tpu.memory_space<semaphore_mem>>
    tpu.wait_dma2 semaphore(%156 : memref<!tpu.dma_semaphore, #tpu.memory_space<semaphore_mem>>) src(%153 : memref<1x32xf32, #tpu.memory_space<any>>) dst(%154 : memref<1x32xf32, #tpu.memory_space<vmem>>)
    %c11_i32_119 = arith.constant 11 : i32
    %c0_i32_120 = arith.constant 0 : i32
    %c0_i32_121 = arith.constant 0 : i32
    %157 = tpu.memref_slice %arg2[%c0_i32_120, %c0_i32_121] : memref<64x32xf32, #tpu.memory_space<any>> -> memref<1x32xf32, #tpu.memory_space<any>>
    %c11_i32_122 = arith.constant 11 : i32
    %c0_i32_123 = arith.constant 0 : i32
    %158 = tpu.memref_slice %arg4[%c11_i32_122, %c0_i32_123] : memref<16x32xf32, #tpu.memory_space<vmem>> -> memref<1x32xf32, #tpu.memory_space<vmem>>
    %159 = tpu.memref_slice %arg5[%c11_i32_119] : memref<16x!tpu.dma_semaphore, #tpu.memory_space<semaphore_mem>> -> memref<1x!tpu.dma_semaphore, #tpu.memory_space<semaphore_mem>>
    %160 = tpu.memref_squeeze %159 : memref<1x!tpu.dma_semaphore, #tpu.memory_space<semaphore_mem>> -> memref<!tpu.dma_semaphore, #tpu.memory_space<semaphore_mem>>
    tpu.wait_dma2 semaphore(%160 : memref<!tpu.dma_semaphore, #tpu.memory_space<semaphore_mem>>) src(%157 : memref<1x32xf32, #tpu.memory_space<any>>) dst(%158 : memref<1x32xf32, #tpu.memory_space<vmem>>)
    %c12_i32_124 = arith.constant 12 : i32
    %c0_i32_125 = arith.constant 0 : i32
    %c0_i32_126 = arith.constant 0 : i32
    %161 = tpu.memref_slice %arg2[%c0_i32_125, %c0_i32_126] : memref<64x32xf32, #tpu.memory_space<any>> -> memref<1x32xf32, #tpu.memory_space<any>>
    %c12_i32_127 = arith.constant 12 : i32
    %c0_i32_128 = arith.constant 0 : i32
    %162 = tpu.memref_slice %arg4[%c12_i32_127, %c0_i32_128] : memref<16x32xf32, #tpu.memory_space<vmem>> -> memref<1x32xf32, #tpu.memory_space<vmem>>
    %163 = tpu.memref_slice %arg5[%c12_i32_124] : memref<16x!tpu.dma_semaphore, #tpu.memory_space<semaphore_mem>> -> memref<1x!tpu.dma_semaphore, #tpu.memory_space<semaphore_mem>>
    %164 = tpu.memref_squeeze %163 : memref<1x!tpu.dma_semaphore, #tpu.memory_space<semaphore_mem>> -> memref<!tpu.dma_semaphore, #tpu.memory_space<semaphore_mem>>
    tpu.wait_dma2 semaphore(%164 : memref<!tpu.dma_semaphore, #tpu.memory_space<semaphore_mem>>) src(%161 : memref<1x32xf32, #tpu.memory_space<any>>) dst(%162 : memref<1x32xf32, #tpu.memory_space<vmem>>)
    %c13_i32_129 = arith.constant 13 : i32
    %c0_i32_130 = arith.constant 0 : i32
    %c0_i32_131 = arith.constant 0 : i32
    %165 = tpu.memref_slice %arg2[%c0_i32_130, %c0_i32_131] : memref<64x32xf32, #tpu.memory_space<any>> -> memref<1x32xf32, #tpu.memory_space<any>>
    %c13_i32_132 = arith.constant 13 : i32
    %c0_i32_133 = arith.constant 0 : i32
    %166 = tpu.memref_slice %arg4[%c13_i32_132, %c0_i32_133] : memref<16x32xf32, #tpu.memory_space<vmem>> -> memref<1x32xf32, #tpu.memory_space<vmem>>
    %167 = tpu.memref_slice %arg5[%c13_i32_129] : memref<16x!tpu.dma_semaphore, #tpu.memory_space<semaphore_mem>> -> memref<1x!tpu.dma_semaphore, #tpu.memory_space<semaphore_mem>>
    %168 = tpu.memref_squeeze %167 : memref<1x!tpu.dma_semaphore, #tpu.memory_space<semaphore_mem>> -> memref<!tpu.dma_semaphore, #tpu.memory_space<semaphore_mem>>
    tpu.wait_dma2 semaphore(%168 : memref<!tpu.dma_semaphore, #tpu.memory_space<semaphore_mem>>) src(%165 : memref<1x32xf32, #tpu.memory_space<any>>) dst(%166 : memref<1x32xf32, #tpu.memory_space<vmem>>)
    %c14_i32_134 = arith.constant 14 : i32
    %c0_i32_135 = arith.constant 0 : i32
    %c0_i32_136 = arith.constant 0 : i32
    %169 = tpu.memref_slice %arg2[%c0_i32_135, %c0_i32_136] : memref<64x32xf32, #tpu.memory_space<any>> -> memref<1x32xf32, #tpu.memory_space<any>>
    %c14_i32_137 = arith.constant 14 : i32
    %c0_i32_138 = arith.constant 0 : i32
    %170 = tpu.memref_slice %arg4[%c14_i32_137, %c0_i32_138] : memref<16x32xf32, #tpu.memory_space<vmem>> -> memref<1x32xf32, #tpu.memory_space<vmem>>
    %171 = tpu.memref_slice %arg5[%c14_i32_134] : memref<16x!tpu.dma_semaphore, #tpu.memory_space<semaphore_mem>> -> memref<1x!tpu.dma_semaphore, #tpu.memory_space<semaphore_mem>>
    %172 = tpu.memref_squeeze %171 : memref<1x!tpu.dma_semaphore, #tpu.memory_space<semaphore_mem>> -> memref<!tpu.dma_semaphore, #tpu.memory_space<semaphore_mem>>
    tpu.wait_dma2 semaphore(%172 : memref<!tpu.dma_semaphore, #tpu.memory_space<semaphore_mem>>) src(%169 : memref<1x32xf32, #tpu.memory_space<any>>) dst(%170 : memref<1x32xf32, #tpu.memory_space<vmem>>)
    %c15_i32_139 = arith.constant 15 : i32
    %c0_i32_140 = arith.constant 0 : i32
    %c0_i32_141 = arith.constant 0 : i32
    %173 = tpu.memref_slice %arg2[%c0_i32_140, %c0_i32_141] : memref<64x32xf32, #tpu.memory_space<any>> -> memref<1x32xf32, #tpu.memory_space<any>>
    %c15_i32_142 = arith.constant 15 : i32
    %c0_i32_143 = arith.constant 0 : i32
    %174 = tpu.memref_slice %arg4[%c15_i32_142, %c0_i32_143] : memref<16x32xf32, #tpu.memory_space<vmem>> -> memref<1x32xf32, #tpu.memory_space<vmem>>
    %175 = tpu.memref_slice %arg5[%c15_i32_139] : memref<16x!tpu.dma_semaphore, #tpu.memory_space<semaphore_mem>> -> memref<1x!tpu.dma_semaphore, #tpu.memory_space<semaphore_mem>>
    %176 = tpu.memref_squeeze %175 : memref<1x!tpu.dma_semaphore, #tpu.memory_space<semaphore_mem>> -> memref<!tpu.dma_semaphore, #tpu.memory_space<semaphore_mem>>
    tpu.wait_dma2 semaphore(%176 : memref<!tpu.dma_semaphore, #tpu.memory_space<semaphore_mem>>) src(%173 : memref<1x32xf32, #tpu.memory_space<any>>) dst(%174 : memref<1x32xf32, #tpu.memory_space<vmem>>)
    %c0 = arith.constant 0 : index
    %c0_144 = arith.constant 0 : index
    %177 = vector.load %arg4[%c0, %c0_144] : memref<16x32xf32, #tpu.memory_space<vmem>>, vector<16x32xf32>
    %cst = arith.constant 5.65685415 : f32
    %178 = vector.broadcast %cst : f32 to vector<16x32xf32>
    %179 = arith.mulf %177, %178 : vector<16x32xf32>
    %c0_145 = arith.constant 0 : index
    %c0_146 = arith.constant 0 : index
    %180 = vector.load %arg3[%c0_145, %c0_146] : memref<16x32xf32, #tpu.memory_space<vmem>>, vector<16x32xf32>
    tpu.vector_store %arg3[%c0_145, %c0_146], %179 {strides = array<i32>} : memref<16x32xf32, #tpu.memory_space<vmem>>, vector<16x32xf32>,
    return
  }
  func.func @transform_1(%arg0: i32, %arg1: memref<16xi32, #tpu.memory_space<smem>>) -> (i32, i32) {
    %c0_i32 = arith.constant 0 : i32
    %c0_i32_0 = arith.constant 0 : i32
    return %arg0, %c0_i32 : i32, i32
  }
}

</mosaic_0001>

<bundles_post_ra>
// kernel: tpu_custom_call.1
= control target key start
LH: loop header
LB: loop body
LE: loop exit
PB: predicated region body
PF: predicated region fallthrough
CT: control target
= control target key end

     0   :  { %s1341_s0 = inlined_call_operand.vmem [shape: s32[16], index: 0, kind: input, shape index: {}]   ;;  %s1342_s1 = inlined_call_operand.vmem [shape: f32[64,32], index: 1, kind: input, shape index: {}]   ;;  %s1343_s2 = inlined_call_operand.hbm [shape: f32[16,32], index: 2, kind: output, shape index: {}]  }
   0x1   :  { %s7_s11 = sshll.u32 %s1341_s0, 4  ;;  %s8_s11 = int_to_ptr.vmem [resolvable:$true] %s7_s11 }
   0x2   :  { %s1189_s12 = scalar_lea.vmem %s8_s11, 16  ;;  %p1194_p1 = scmp.lt.s32.totalorder %s8_s11, %s8_s11 }
   0x3   :  { %p1190_p0 = scmp.ne.s32.totalorder %s8_s11, %s1189_s12  ;;  %p1195_p2 = scmp.lt.s32.totalorder %s1189_s12, %s1189_s12 }
   0x5   :  { %p1196_p3 = por %p1195_p2, %p1194_p1 }
   0x7   :  { %p1197_p4 = pnand %p1196_p3, %p1190_p0 }
   0x9   :  { %1200 = shalt.err (!%p1197_p4)  }
   0xa   :  { %s1259_s13 = smov [#allocation5]  }
   0xb   :  { %10 = dma.vmem_to_smem %s8_s11, 16, %s1259_s13, [#allocation4] }
   0xc   :  { %1223 = dma.done.wait [#allocation4], 16 }
   0xd   :  { %1224 = vsyncadd [#allocation4], 4294967280 }
   0xe   :  { %12 = sfence }
   0xf   :  { %13 = vsyncpa [#allocation7], 0  ;;  %s15_s14 = sld [smem:[#allocation5]] }
  0x15   :  { %s16_s17 = scalar_lea.vmem %s1342_s1, %s15_s14 }
  0x16   :  { %v34_v0 = vld [vmem:[%s16_s17] sm:$0x1] }
  0x17   :  { %35 = vst [vmem:[#allocation2] sm:$0x1] %v34_v0 }
  0x18   :  { %60 = vsyncadd [#allocation3], 16  ;;  %s1154_s0 = sld [smem:[#allocation5 + $0x1]] }
  0x1e   :  { %s63_s20 = scalar_lea.vmem %s1342_s1, %s1154_s0 }
  0x1f   :  { %v83_v1 = vld [vmem:[%s63_s20] sm:$0x1] }
  0x20   :  { %84 = vst [vmem:[#allocation2 + $0x1] sm:$0x1] %v83_v1 }
  0x21   :  { %109 = vsyncadd [#allocation3 + $0x1], 16  ;;  %s1155_s21 = sld [smem:[#allocation5 + $0x2]] }
  0x27   :  { %s112_s24 = scalar_lea.vmem %s1342_s1, %s1155_s21 }
  0x28   :  { %v132_v2 = vld [vmem:[%s112_s24] sm:$0x1] }
  0x29   :  { %133 = vst [vmem:[#allocation2 + $0x2] sm:$0x1] %v132_v2 }
  0x2a   :  { %158 = vsyncadd [#allocation3 + $0x2], 16  ;;  %s1156_s25 = sld [smem:[#allocation5 + $0x3]] }
  0x30   :  { %s161_s28 = scalar_lea.vmem %s1342_s1, %s1156_s25 }
  0x31   :  { %v181_v3 = vld [vmem:[%s161_s28] sm:$0x1] }
  0x32   :  { %182 = vst [vmem:[#allocation2 + $0x3] sm:$0x1] %v181_v3 }
  0x33   :  { %207 = vsyncadd [#allocation3 + $0x3], 16  ;;  %s1157_s29 = sld [smem:[#allocation5 + $0x4]] }
  0x39   :  { %s210_s4 = scalar_lea.vmem %s1342_s1, %s1157_s29 }
  0x3a   :  { %v230_v4 = vld [vmem:[%s210_s4] sm:$0x1] }
  0x3b   :  { %231 = vst [vmem:[#allocation2 + $0x4] sm:$0x1] %v230_v4 }
  0x3c   :  { %256 = vsyncadd [#allocation3 + $0x4], 16  ;;  %s1158_s5 = sld [smem:[#allocation5 + $0x5]] }
  0x42   :  { %s259_s8 = scalar_lea.vmem %s1342_s1, %s1158_s5 }
  0x43   :  { %v279_v5 = vld [vmem:[%s259_s8] sm:$0x1] }
  0x44   :  { %280 = vst [vmem:[#allocation2 + $0x5] sm:$0x1] %v279_v5 }
  0x45   :  { %305 = vsyncadd [#allocation3 + $0x5], 16  ;;  %s1159_s9 = sld [smem:[#allocation5 + $0x6]] }
  0x4b   :  { %s308_s12 = scalar_lea.vmem %s1342_s1, %s1159_s9 }
  0x4c   :  { %v328_v6 = vld [vmem:[%s308_s12] sm:$0x1] }
  0x4d   :  { %329 = vst [vmem:[#allocation2 + $0x6] sm:$0x1] %v328_v6 }
  0x4e   :  { %354 = vsyncadd [#allocation3 + $0x6], 16  ;;  %s1160_s13 = sld [smem:[#allocation5 + $0x7]] }
  0x54   :  { %s357_s16 = scalar_lea.vmem %s1342_s1, %s1160_s13 }
  0x55   :  { %v377_v7 = vld [vmem:[%s357_s16] sm:$0x1] }
  0x56   :  { %378 = vst [vmem:[#allocation2 + $0x7] sm:$0x1] %v377_v7 }
  0x57   :  { %403 = vsyncadd [#allocation3 + $0x7], 16  ;;  %s1161_s17 = sld [smem:[#allocation5 + $0x8]] }
  0x5d   :  { %s406_s19 = scalar_lea.vmem %s1342_s1, %s1161_s17 }
  0x5e   :  { %v426_v8 = vld [vmem:[%s406_s19] sm:$0x1] }
  0x5f   :  { %427 = vst [vmem:[#allocation2 + $0x8] sm:$0x1] %v426_v8 }
  0x60   :  { %452 = vsyncadd [#allocation3 + $0x8], 16  ;;  %s1162_s20 = sld [smem:[#allocation5 + $0x9]] }
  0x66   :  { %s455_s23 = scalar_lea.vmem %s1342_s1, %s1162_s20 }
  0x67   :  { %v475_v9 = vld [vmem:[%s455_s23] sm:$0x1] }
  0x68   :  { %476 = vst [vmem:[#allocation2 + $0x9] sm:$0x1] %v475_v9 }
  0x69   :  { %501 = vsyncadd [#allocation3 + $0x9], 16  ;;  %s1163_s24 = sld [smem:[#allocation5 + $0xa]] }
  0x6f   :  { %s504_s27 = scalar_lea.vmem %s1342_s1, %s1163_s24 }
  0x70   :  { %v524_v10 = vld [vmem:[%s504_s27] sm:$0x1] }
  0x71   :  { %525 = vst [vmem:[#allocation2 + $0xa] sm:$0x1] %v524_v10 }
  0x72   :  { %550 = vsyncadd [#allocation3 + $0xa], 16  ;;  %s1164_s28 = sld [smem:[#allocation5 + $0xb]] }
  0x78   :  { %s553_s3 = scalar_lea.vmem %s1342_s1, %s1164_s28 }
  0x79   :  { %v573_v11 = vld [vmem:[%s553_s3] sm:$0x1] }
  0x7a   :  { %574 = vst [vmem:[#allocation2 + $0xb] sm:$0x1] %v573_v11 }
  0x7b   :  { %599 = vsyncadd [#allocation3 + $0xb], 16  ;;  %s1165_s4 = sld [smem:[#allocation5 + $0xc]] }
  0x81   :  { %s602_s7 = scalar_lea.vmem %s1342_s1, %s1165_s4 }
  0x82   :  { %v622_v12 = vld [vmem:[%s602_s7] sm:$0x1] }
  0x83   :  { %623 = vst [vmem:[#allocation2 + $0xc] sm:$0x1] %v622_v12 }
  0x84   :  { %648 = vsyncadd [#allocation3 + $0xc], 16  ;;  %s1166_s8 = sld [smem:[#allocation5 + $0xd]] }
  0x8a   :  { %s651_s11 = scalar_lea.vmem %s1342_s1, %s1166_s8 }
  0x8b   :  { %v671_v13 = vld [vmem:[%s651_s11] sm:$0x1] }
  0x8c   :  { %672 = vst [vmem:[#allocation2 + $0xd] sm:$0x1] %v671_v13 }
  0x8d   :  { %697 = vsyncadd [#allocation3 + $0xd], 16  ;;  %s1167_s12 = sld [smem:[#allocation5 + $0xe]] }
  0x93   :  { %s700_s15 = scalar_lea.vmem %s1342_s1, %s1167_s12 }
  0x94   :  { %v720_v14 = vld [vmem:[%s700_s15] sm:$0x1] }
  0x95   :  { %721 = vst [vmem:[#allocation2 + $0xe] sm:$0x1] %v720_v14 }
  0x96   :  { %746 = vsyncadd [#allocation3 + $0xe], 16  ;;  %s1168_s16 = sld [smem:[#allocation5 + $0xf]] }
  0x9c   :  { %s749_s18 = scalar_lea.vmem %s1342_s1, %s1168_s16 }
  0x9d   :  { %v769_v15 = vld [vmem:[%s749_s18] sm:$0x1] }
  0x9e   :  { %770 = vst [vmem:[#allocation2 + $0xf] sm:$0x1] %v769_v15 }
  0x9f   :  { %795 = vsyncadd [#allocation3 + $0xf], 16 }
  0xa0   :  { %1225 = dma.done.wait [#allocation3], 16 }
  0xa1   :  { %1226 = vsyncadd [#allocation3], 4294967280 }
  0xa2   :  { %1227 = dma.done.wait [#allocation3 + $0x1], 16 }
  0xa3   :  { %1228 = vsyncadd [#allocation3 + $0x1], 4294967280 }
  0xa4   :  { %1229 = dma.done.wait [#allocation3 + $0x2], 16 }
  0xa5   :  { %1230 = vsyncadd [#allocation3 + $0x2], 4294967280 }
  0xa6   :  { %1231 = dma.done.wait [#allocation3 + $0x3], 16 }
  0xa7   :  { %1232 = vsyncadd [#allocation3 + $0x3], 4294967280 }
  0xa8   :  { %1233 = dma.done.wait [#allocation3 + $0x4], 16 }
  0xa9   :  { %1234 = vsyncadd [#allocation3 + $0x4], 4294967280 }
  0xaa   :  { %1235 = dma.done.wait [#allocation3 + $0x5], 16 }
  0xab   :  { %1236 = vsyncadd [#allocation3 + $0x5], 4294967280 }
  0xac   :  { %1237 = dma.done.wait [#allocation3 + $0x6], 16 }
  0xad   :  { %1238 = vsyncadd [#allocation3 + $0x6], 4294967280 }
  0xae   :  { %1239 = dma.done.wait [#allocation3 + $0x7], 16 }
  0xaf   :  { %1240 = vsyncadd [#allocation3 + $0x7], 4294967280 }
  0xb0   :  { %1241 = dma.done.wait [#allocation3 + $0x8], 16 }
  0xb1   :  { %1242 = vsyncadd [#allocation3 + $0x8], 4294967280 }
  0xb2   :  { %1243 = dma.done.wait [#allocation3 + $0x9], 16 }
  0xb3   :  { %1244 = vsyncadd [#allocation3 + $0x9], 4294967280 }
  0xb4   :  { %1245 = dma.done.wait [#allocation3 + $0xa], 16 }
  0xb5   :  { %1246 = vsyncadd [#allocation3 + $0xa], 4294967280 }
  0xb6   :  { %1247 = dma.done.wait [#allocation3 + $0xb], 16 }
  0xb7   :  { %1248 = vsyncadd [#allocation3 + $0xb], 4294967280 }
  0xb8   :  { %1249 = dma.done.wait [#allocation3 + $0xc], 16 }
  0xb9   :  { %1250 = vsyncadd [#allocation3 + $0xc], 4294967280 }
  0xba   :  { %1251 = dma.done.wait [#allocation3 + $0xd], 16 }
  0xbb   :  { %1252 = vsyncadd [#allocation3 + $0xd], 4294967280 }
  0xbc   :  { %1253 = dma.done.wait [#allocation3 + $0xe], 16 }
  0xbd   :  { %1254 = vsyncadd [#allocation3 + $0xe], 4294967280 }
  0xbe   :  { %1255 = dma.done.wait [#allocation3 + $0xf], 16 }
  0xbf   :  { %1256 = vsyncadd [#allocation3 + $0xf], 4294967280  ;;  %s1260_s1 = smov [#allocation6]   ;;  %v829_v16 = vld [vmem:[#allocation2] sm:$0xff]  ;;  %vm833_vm0 = vcmask 261120   ;;  %v830_v17 = vld [vmem:[#allocation2 + $0x8] sm:$0xff] }
  0xc0   :  { %s841_s19 = sshll.u32 %s1260_s1, 4  ;;  %v831_v18 = vmul.f32 5.656854, %v829_v16  ;;  %v832_v19 = vmul.f32 5.656854, %v830_v17  ;;  %s842_s19 = int_to_ptr.vmem [resolvable:$true] %s841_s19 }
  0xc1   :  { %s1201_s20 = scalar_lea.vmem %s842_s19, 256  ;;  %p1206_p6 = scmp.lt.s32.totalorder %s842_s19, %s842_s19 }
  0xc2   :  { %834 = vst.msk [vmem:[#allocation6] sm:$0xff] %vm833_vm0, %v831_v18  ;;  %835 = vst.msk [vmem:[#allocation6 + $0x8] sm:$0xff] %vm833_vm0, %v832_v19  ;;  %p1202_p5 = scmp.ne.s32.totalorder %s842_s19, %s1201_s20  ;;  %p1207_p7 = scmp.lt.s32.totalorder %s1201_s20, %s1201_s20 }
  0xc4   :  { %p1208_p8 = por %p1207_p7, %p1206_p6 }
  0xc6   :  { %p1209_p9 = pnand %p1208_p8, %p1202_p5 }
  0xc8   :  { %1212 = shalt.err (!%p1209_p9)
}
  0xc9   :  { %s1213_s23 = scalar_lea.hbm %s1343_s2, 256 }
  0xca   :  { %p1214_p10 = scmp.ne.s32.totalorder %s1343_s2, %s1213_s23  ;;  %p1217_p11 = scmp.lt.u32.totalorder %s1213_s23, %s1343_s2 }
  0xcc   :  { %p1219_p12 = pnand %p1217_p11, %p1214_p10 }
  0xce   :  { %1222 = shalt.err (!%p1219_p12)
}
  0xcf   :  { %s1261_s28 = smov 128   ;;  %s1262_s29 = smov 8  }
  0xd0   :  { %847 = dma.vmem_to_hbm [thread:$0]  %s842_s19, 256, %s1343_s2, [#allocation7], %s1261_s28, %s1261_s28, %s1262_s29  }
  0xd1   :  { %1257 = dma.done.wait [#allocation7], 256  }
  0xd2   :  { %1258 = vsyncadd [#allocation7], 4294967040 }
  0xd3   :  { %851 = vsyncpa [#allocation7], 1 }
  0xd4   :  { %852 = vsyncmov [#allocation3] }
  0xd7   :  { %s853_s4 = vpop.sfrf %852 }
  0xd8   :  { %p1169_p13 = scmp.ne.s32.totalorder %s853_s4, 0 }
  0xda   :  { %857 = shalt.err (%p1169_p13)  }
  0xdb   :  { %859 = vsyncmov [#allocation3 + $0x1] }
  0xde   :  { %s860_s5 = vpop.sfrf %859 }
  0xdf   :  { %p1170_p0 = scmp.ne.s32.totalorder %s860_s5, 0 }
  0xe1   :  { %864 = shalt.err (%p1170_p0)  }
  0xe2   :  { %866 = vsyncmov [#allocation3 + $0x2] }
  0xe5   :  { %s867_s6 = vpop.sfrf %866 }
  0xe6   :  { %p1171_p1 = scmp.ne.s32.totalorder %s867_s6, 0 }
  0xe8   :  { %871 = shalt.err (%p1171_p1)  }
  0xe9   :  { %873 = vsyncmov [#allocation3 + $0x3] }
  0xec   :  { %s874_s7 = vpop.sfrf %873 }
  0xed   :  { %p1172_p2 = scmp.ne.s32.totalorder %s874_s7, 0 }
  0xef   :  { %878 = shalt.err (%p1172_p2)  }
  0xf0   :  { %880 = vsyncmov [#allocation3 + $0x4] }
  0xf3   :  { %s881_s2 = vpop.sfrf %880 }
  0xf4   :  { %p1173_p3 = scmp.ne.s32.totalorder %s881_s2, 0 }
  0xf6   :  { %885 = shalt.err (%p1173_p3)  }
  0xf7   :  { %887 = vsyncmov [#allocation3 + $0x5] }
  0xfa   :  { %s888_s8 = vpop.sfrf %887 }
  0xfb   :  { %p1174_p4 = scmp.ne.s32.totalorder %s888_s8, 0 }
  0xfd   :  { %892 = shalt.err (%p1174_p4)  }
  0xfe   :  { %894 = vsyncmov [#allocation3 + $0x6] }
 0x101   :  { %s895_s9 = vpop.sfrf %894 }
 0x102   :  { %p1175_p5 = scmp.ne.s32.totalorder %s895_s9, 0 }
 0x104   :  { %899 = shalt.err (%p1175_p5)  }
 0x105   :  { %901 = vsyncmov [#allocation3 + $0x7] }
 0x108   :  { %s902_s10 = vpop.sfrf %901 }
 0x109   :  { %p1176_p6 = scmp.ne.s32.totalorder %s902_s10, 0 }
 0x10b   :  { %906 = shalt.err (%p1176_p6)  }
 0x10c   :  { %908 = vsyncmov [#allocation3 + $0x8] }
 0x10f   :  { %s909_s11 = vpop.sfrf %908 }
 0x110   :  { %p1177_p7 = scmp.ne.s32.totalorder %s909_s11, 0 }
 0x112   :  { %913 = shalt.err (%p1177_p7)  }
 0x113   :  { %915 = vsyncmov [#allocation3 + $0x9] }
 0x116   :  { %s916_s12 = vpop.sfrf %915 }
 0x117   :  { %p1178_p8 = scmp.ne.s32.totalorder %s916_s12, 0 }
 0x119   :  { %920 = shalt.err (%p1178_p8)  }
 0x11a   :  { %922 = vsyncmov [#allocation3 + $0xa] }
 0x11d   :  { %s923_s13 = vpop.sfrf %922 }
 0x11e   :  { %p1179_p9 = scmp.ne.s32.totalorder %s923_s13, 0 }
 0x120   :  { %927 = shalt.err (%p1179_p9)  }
 0x121   :  { %929 = vsyncmov [#allocation3 + $0xb] }
 0x124   :  { %s930_s14 = vpop.sfrf %929 }
 0x125   :  { %p1180_p10 = scmp.ne.s32.totalorder %s930_s14, 0 }
 0x127   :  { %934 = shalt.err (%p1180_p10)  }
 0x128   :  { %936 = vsyncmov [#allocation3 + $0xc] }
 0x12b   :  { %s937_s15 = vpop.sfrf %936 }
 0x12c   :  { %p1181_p11 = scmp.ne.s32.totalorder %s937_s15, 0 }
 0x12e   :  { %941 = shalt.err (%p1181_p11)  }
 0x12f   :  { %943 = vsyncmov [#allocation3 + $0xd] }
 0x132   :  { %s944_s16 = vpop.sfrf %943 }
 0x133   :  { %p1182_p12 = scmp.ne.s32.totalorder %s944_s16, 0 }
 0x135   :  { %948 = shalt.err (%p1182_p12)  }
 0x136   :  { %950 = vsyncmov [#allocation3 + $0xe] }
 0x139   :  { %s951_s17 = vpop.sfrf %950 }
 0x13a   :  { %p1183_p13 = scmp.ne.s32.totalorder %s951_s17, 0 }
 0x13c   :  { %955 = shalt.err (%p1183_p13)  }
 0x13d   :  { %957 = vsyncmov [#allocation3 + $0xf] }
 0x140   :  { %s958_s0 = vpop.sfrf %957 }
 0x141   :  { %p1184_p0 = scmp.ne.s32.totalorder %s958_s0, 0 }
 0x143   :  { %962 = shalt.err (%p1184_p0)  }

</bundles_post_ra>
